<compile_context>
chip_gen: v7x
topology: tpu7x:2x2x1
jax: 0.10.0
libtpu: 0.0.40
codegen_flags: <defaults>
</compile_context>

<pallas_src>
import jax
import jax.numpy as jnp
from jax.experimental import pallas as pl
from jax.experimental.pallas import tpu as pltpu

N_NODES = 16
IN_DIM = 32
HIDDEN = 32
PAD_DIM = 128          # lane-dense feature axis (full 128-lane vreg width)
DROPOUT_P = 0.2
BN_EPS = 1e-5


# ----------------------------- Pallas kernel --------------------------------

def _bgrl_fused_kernel(alpha_ref,
                       x_ref, a_ref, we_ref, be_ref,
                       wp_ref, bp_ref, g_ref, bt_ref, u_ref,
                       h_ref, p_ref):
    # ---- stand-in GCN encoder: h = relu(A_hat @ (x @ W_enc) + b_enc) ----
    z = jnp.dot(x_ref[...], we_ref[...], preferred_element_type=jnp.float32)
    h = jnp.dot(a_ref[...], z, preferred_element_type=jnp.float32) + be_ref[...]
    h = jnp.maximum(h, 0.0)
    h_ref[...] = h                               # reused for h1/h2/h*_target

    # ---- predictor: Linear -> BatchNorm1d (training batch stats, biased var,
    #      eps=1e-5) -> PReLU (shared alpha) -> Dropout(p=0.2, inverted) ----
    y = jnp.dot(h, wp_ref[...], preferred_element_type=jnp.float32) + bp_ref[...]
    mean = jnp.mean(y, axis=0, keepdims=True)
    var = jnp.mean((y - mean) ** 2, axis=0, keepdims=True)   # biased, like BN
    y_bn = (y - mean) * jax.lax.rsqrt(var + BN_EPS) * g_ref[...] + bt_ref[...]

    a = alpha_ref[0]                                          # PReLU slope
    act = jnp.where(y_bn >= 0.0, y_bn, a * y_bn)

    # Two independent inverted-dropout draws (one per view), fused here.
    # u_ref is (2, N, PAD_DIM) uniform[0,1); keep probability = 1 - p.
    keep = u_ref[...] >= DROPOUT_P
    scale = 1.0 / (1.0 - DROPOUT_P)
    p_ref[...] = jnp.where(keep, act[None, :, :] * scale, 0.0)


# ------------------------------ Wrappers -------------------------------------

_VMEM = pl.BlockSpec(memory_space=pltpu.MemorySpace.VMEM)
_SMEM = pl.BlockSpec(memory_space=pltpu.MemorySpace.SMEM)


def _fused_forward(pp, x_pad, a_hat, dropout_u):
    # Whole-array VMEM residency (working set < 300 KB): no grid/tiling needed
    # on any TPU generation; adding a grid would only add per-step overhead.
    n = x_pad.shape[0]
    h_pad, pred_pad = pl.pallas_call(
        _bgrl_fused_kernel,
        out_shape=(jax.ShapeDtypeStruct((n, PAD_DIM), jnp.float32),
                   jax.ShapeDtypeStruct((2, n, PAD_DIM), jnp.float32)),
        in_specs=[_SMEM] + [_VMEM] * 9,
        out_specs=(_VMEM, _VMEM),
    )(pp["prelu_a"], x_pad, a_hat, pp["enc_w"], pp["enc_b"],
      pp["pred_w"], pp["pred_b"], pp["bn_gamma"], pp["bn_beta"], dropout_u)
    return h_pad, pred_pad


def normalized_adj(edge_index, n):
    # Glue (plain JAX): dense symmetric-normalized adjacency with self loops.
    # Hoisted: build once per graph and pass A_hat into the forward.
    a = jnp.zeros((n, n), jnp.float32)
    a = a.at[edge_index[0], edge_index[1]].set(1.0)
    a = a.at[edge_index[1], edge_index[0]].set(1.0)
    a = a + jnp.eye(n, dtype=jnp.float32)
    d = jnp.sum(a, axis=1)
    d_inv_sqrt = jax.lax.rsqrt(d)
    return a * d_inv_sqrt[:, None] * d_inv_sqrt[None, :]


def bgrl_encoder_forward(padded_params, x, a_hat, dropout_u):
    # TODO(synk): `encoder` and `augmentor` are injected dependencies in the
    # original module; identity augmentations + a single-layer GCN stand-in
    # are used here.  With identity augmentors and a frozen deepcopy target,
    # the four encoder evaluations coincide, so the encoder runs ONCE and the
    # result is aliased into h1 / h2 / h1_target / h2_target.
    x_pad = jnp.pad(x, ((0, 0), (0, PAD_DIM - x.shape[1])))
    h_pad, pred_pad = _fused_forward(padded_params, x_pad, a_hat, dropout_u)

    h = h_pad[:, :HIDDEN]
    h1, h2 = h, h
    h1_target, h2_target = h, h
    h1_pred = pred_pad[0, :, :HIDDEN]
    h2_pred = pred_pad[1, :, :HIDDEN]
    return h1, h2, h1_pred, h2_pred, h1_target, h2_target


def init_params(key):
    k1, k2, k3 = jax.random.split(key, 3)
    scale_enc = 1.0 / jnp.sqrt(IN_DIM)
    scale_pred = 1.0 / jnp.sqrt(HIDDEN)
    return {
        "enc_w": jax.random.normal(k1, (IN_DIM, HIDDEN), jnp.float32) * scale_enc,
        "enc_b": jnp.zeros((1, HIDDEN), jnp.float32),
        "pred_w": jax.random.normal(k2, (HIDDEN, HIDDEN), jnp.float32) * scale_pred,
        "pred_b": jax.random.uniform(k3, (1, HIDDEN), jnp.float32,
                                     -scale_pred, scale_pred),
        "bn_gamma": jnp.ones((1, HIDDEN), jnp.float32),
        "bn_beta": jnp.zeros((1, HIDDEN), jnp.float32),
        "prelu_a": jnp.array([0.25], jnp.float32),        # PReLU default init
    }


def pad_params(p):
    # Zero-pad feature axes to 128 lanes ONCE (hoisted out of the forward).
    # Padded columns remain exactly zero through encoder/linear/BN/PReLU/dropout
    # (BN is per-column), so the real 32 columns are unchanged.
    def pad2(w):
        return jnp.pad(w, ((0, PAD_DIM - w.shape[0]), (0, PAD_DIM - w.shape[1])))

    def padc(v):
        return jnp.pad(v, ((0, 0), (0, PAD_DIM - v.shape[1])))

    return {
        "enc_w": pad2(p["enc_w"]),
        "enc_b": padc(p["enc_b"]),
        "pred_w": pad2(p["pred_w"]),
        "pred_b": padc(p["pred_b"]),
        "bn_gamma": padc(p["bn_gamma"]),
        "bn_beta": padc(p["bn_beta"]),
        "prelu_a": p["prelu_a"],
    }


if __name__ == "__main__":
    key = jax.random.PRNGKey(0)
    kp, kx, kd = jax.random.split(key, 3)
    params = init_params(kp)
    pparams = pad_params(params)

    x = jax.random.normal(kx, (N_NODES, IN_DIM), jnp.float32)
    # simple ring graph + a few chords
    src = jnp.arange(N_NODES, dtype=jnp.int32)
    dst = (src + 1) % N_NODES
    src2 = jnp.arange(N_NODES, dtype=jnp.int32)
    dst2 = (src2 + 4) % N_NODES
    edge_index = jnp.stack([jnp.concatenate([src, src2]),
                            jnp.concatenate([dst, dst2])], axis=0)

    # Hoisted per-graph preprocessing (identity augmentors => one A_hat).
    a_hat = normalized_adj(edge_index, N_NODES)
    # Two independent dropout draws (training semantics), generated with
    # jax.random and consumed in-kernel.  TODO(synk): RNG stream differs from
    # torch's; the Bernoulli(keep=0.8) distribution matches.
    dropout_u = jax.random.uniform(kd, (2, N_NODES, PAD_DIM), jnp.float32)

    outs = bgrl_encoder_forward(pparams, x, a_hat, dropout_u)
    outs = jax.block_until_ready(outs)

    h1, h2, h1_pred, h2_pred, h1_target, h2_target = outs
    assert h1.shape == (N_NODES, HIDDEN)
    assert h2.shape == (N_NODES, HIDDEN)
    assert h1_pred.shape == (N_NODES, HIDDEN)
    assert h2_pred.shape == (N_NODES, HIDDEN)
    assert h1_target.shape == (N_NODES, HIDDEN)
    assert h2_target.shape == (N_NODES, HIDDEN)
    assert all(bool(jnp.all(jnp.isfinite(o))) for o in outs)

    print("KERNEL_OK")
</pallas_src>

<mosaic_0001>
module attributes {stable_mosaic.version = 11 : i64} {
  func.func @_bgrl_fused_kernel(%arg0: memref<1xf32, #tpu.memory_space<smem>>, %arg1: memref<16x128xf32, #tpu.memory_space<vmem>>, %arg2: memref<16x16xf32, #tpu.memory_space<vmem>>, %arg3: memref<128x128xf32, #tpu.memory_space<vmem>>, %arg4: memref<1x128xf32, #tpu.memory_space<vmem>>, %arg5: memref<128x128xf32, #tpu.memory_space<vmem>>, %arg6: memref<1x128xf32, #tpu.memory_space<vmem>>, %arg7: memref<1x128xf32, #tpu.memory_space<vmem>>, %arg8: memref<1x128xf32, #tpu.memory_space<vmem>>, %arg9: memref<2x16x128xf32, #tpu.memory_space<vmem>>, %arg10: memref<16x128xf32, #tpu.memory_space<vmem>>, %arg11: memref<2x16x128xf32, #tpu.memory_space<vmem>>) attributes {dimension_semantics = [], scalar_prefetch = 0 : i64, scratch_operands = 0 : i64, tpu.core_type = #tpu.core_type<tc>} {
    %c0 = arith.constant 0 : index
    %c0_0 = arith.constant 0 : index
    %0 = vector.load %arg1[%c0, %c0_0] : memref<16x128xf32, #tpu.memory_space<vmem>>, vector<16x128xf32>
    %c0_1 = arith.constant 0 : index
    %c0_2 = arith.constant 0 : index
    %1 = vector.load %arg3[%c0_1, %c0_2] : memref<128x128xf32, #tpu.memory_space<vmem>>, vector<128x128xf32>
    %cst = arith.constant dense<0.000000e+00> : vector<16x128xf32>
    %2 = tpu.matmul %0, %1, %cst {dimension_numbers = #tpu.dot_dimension_numbers<[1], [0], [0], [1], [0, 0, 1, 1], [], []>} : vector<16x128xf32>, vector<128x128xf32>, vector<16x128xf32> -> vector<16x128xf32>
    %c0_3 = arith.constant 0 : index
    %c0_4 = arith.constant 0 : index
    %3 = vector.load %arg2[%c0_3, %c0_4] : memref<16x16xf32, #tpu.memory_space<vmem>>, vector<16x16xf32>
    %cst_5 = arith.constant dense<0.000000e+00> : vector<16x128xf32>
    %4 = tpu.matmul %3, %2, %cst_5 {dimension_numbers = #tpu.dot_dimension_numbers<[1], [0], [0], [1], [0, 0, 1, 1], [], []>} : vector<16x16xf32>, vector<16x128xf32>, vector<16x128xf32> -> vector<16x128xf32>
    %c0_6 = arith.constant 0 : index
    %c0_7 = arith.constant 0 : index
    %5 = vector.load %arg4[%c0_6, %c0_7] : memref<1x128xf32, #tpu.memory_space<vmem>>, vector<1x128xf32>
    %6 = vector.broadcast %5 : vector<1x128xf32> to vector<16x128xf32>
    %7 = arith.addf %4, %6 : vector<16x128xf32>
    %cst_8 = arith.constant 0.000000e+00 : f32
    %8 = vector.broadcast %cst_8 : f32 to vector<16x128xf32>
    %9 = arith.maximumf %7, %8 : vector<16x128xf32>
    %c0_9 = arith.constant 0 : index
    %c0_10 = arith.constant 0 : index
    %10 = vector.load %arg10[%c0_9, %c0_10] : memref<16x128xf32, #tpu.memory_space<vmem>>, vector<16x128xf32>
    tpu.vector_store %arg10[%c0_9, %c0_10], %9 {strides = array<i32>} : memref<16x128xf32, #tpu.memory_space<vmem>>, vector<16x128xf32>,
    %c0_11 = arith.constant 0 : index
    %c0_12 = arith.constant 0 : index
    %11 = vector.load %arg5[%c0_11, %c0_12] : memref<128x128xf32, #tpu.memory_space<vmem>>, vector<128x128xf32>
    %cst_13 = arith.constant dense<0.000000e+00> : vector<16x128xf32>
    %12 = tpu.matmul %9, %11, %cst_13 {dimension_numbers = #tpu.dot_dimension_numbers<[1], [0], [0], [1], [0, 0, 1, 1], [], []>} : vector<16x128xf32>, vector<128x128xf32>, vector<16x128xf32> -> vector<16x128xf32>
    %c0_14 = arith.constant 0 : index
    %c0_15 = arith.constant 0 : index
    %13 = vector.load %arg6[%c0_14, %c0_15] : memref<1x128xf32, #tpu.memory_space<vmem>>, vector<1x128xf32>
    %14 = vector.broadcast %13 : vector<1x128xf32> to vector<16x128xf32>
    %15 = arith.addf %12, %14 : vector<16x128xf32>
    %cst_16 = arith.constant dense<0.000000e+00> : vector<128xf32>
    %16 = vector.multi_reduction <add>, %15, %cst_16 [0] : vector<16x128xf32> to vector<128xf32>
    %17 = vector.shape_cast %16 : vector<128xf32> to vector<1x128xf32>
    %cst_17 = arith.constant 1.600000e+01 : f32
    %18 = vector.broadcast %cst_17 : f32 to vector<1x128xf32>
    %19 = arith.divf %17, %18 : vector<1x128xf32>
    %20 = vector.broadcast %19 : vector<1x128xf32> to vector<16x128xf32>
    %21 = arith.subf %15, %20 : vector<16x128xf32>
    %22 = arith.mulf %21, %21 : vector<16x128xf32>
    %cst_18 = arith.constant dense<0.000000e+00> : vector<128xf32>
    %23 = vector.multi_reduction <add>, %22, %cst_18 [0] : vector<16x128xf32> to vector<128xf32>
    %24 = vector.shape_cast %23 : vector<128xf32> to vector<1x128xf32>
    %cst_19 = arith.constant 1.600000e+01 : f32
    %25 = vector.broadcast %cst_19 : f32 to vector<1x128xf32>
    %26 = arith.divf %24, %25 : vector<1x128xf32>
    %27 = vector.broadcast %19 : vector<1x128xf32> to vector<16x128xf32>
    %28 = arith.subf %15, %27 : vector<16x128xf32>
    %cst_20 = arith.constant 9.99999974E-6 : f32
    %29 = vector.broadcast %cst_20 : f32 to vector<1x128xf32>
    %30 = arith.addf %26, %29 : vector<1x128xf32>
    %31 = math.rsqrt %30 : vector<1x128xf32>
    %32 = vector.broadcast %31 : vector<1x128xf32> to vector<16x128xf32>
    %33 = arith.mulf %28, %32 : vector<16x128xf32>
    %c0_21 = arith.constant 0 : index
    %c0_22 = arith.constant 0 : index
    %34 = vector.load %arg7[%c0_21, %c0_22] : memref<1x128xf32, #tpu.memory_space<vmem>>, vector<1x128xf32>
    %35 = vector.broadcast %34 : vector<1x128xf32> to vector<16x128xf32>
    %36 = arith.mulf %33, %35 : vector<16x128xf32>
    %c0_23 = arith.constant 0 : index
    %c0_24 = arith.constant 0 : index
    %37 = vector.load %arg8[%c0_23, %c0_24] : memref<1x128xf32, #tpu.memory_space<vmem>>, vector<1x128xf32>
    %38 = vector.broadcast %37 : vector<1x128xf32> to vector<16x128xf32>
    %39 = arith.addf %36, %38 : vector<16x128xf32>
    %c0_25 = arith.constant 0 : index
    %40 = memref.load %arg0[%c0_25] : memref<1xf32, #tpu.memory_space<smem>>
    %cst_26 = arith.constant 0.000000e+00 : f32
    %41 = vector.broadcast %cst_26 : f32 to vector<16x128xf32>
    %42 = arith.cmpf oge, %39, %41 : vector<16x128xf32>
    %43 = vector.broadcast %40 : f32 to vector<16x128xf32>
    %44 = arith.mulf %43, %39 : vector<16x128xf32>
    %45 = arith.select %42, %39, %44 : vector<16x128xi1>, vector<16x128xf32>
    %c0_27 = arith.constant 0 : index
    %c0_28 = arith.constant 0 : index
    %c0_29 = arith.constant 0 : index
    %46 = vector.load %arg9[%c0_27, %c0_28, %c0_29] : memref<2x16x128xf32, #tpu.memory_space<vmem>>, vector<2x16x128xf32>
    %cst_30 = arith.constant 2.000000e-01 : f32
    %47 = vector.broadcast %cst_30 : f32 to vector<2x16x128xf32>
    %48 = arith.cmpf oge, %46, %47 : vector<2x16x128xf32>
    %49 = vector.shape_cast %45 : vector<16x128xf32> to vector<1x16x128xf32>
    %cst_31 = arith.constant 1.250000e+00 : f32
    %50 = vector.broadcast %cst_31 : f32 to vector<1x16x128xf32>
    %51 = arith.mulf %49, %50 : vector<1x16x128xf32>
    %cst_32 = arith.constant 0.000000e+00 : f32
    %52 = vector.shape_cast %51 : vector<1x16x128xf32> to vector<1x16x128xf32>
    %53 = vector.broadcast %52 : vector<1x16x128xf32> to vector<2x16x128xf32>
    %54 = vector.broadcast %cst_32 : f32 to vector<2x16x128xf32>
    %55 = arith.select %48, %53, %54 : vector<2x16x128xi1>, vector<2x16x128xf32>
    %c0_33 = arith.constant 0 : index
    %c0_34 = arith.constant 0 : index
    %c0_35 = arith.constant 0 : index
    %56 = vector.load %arg11[%c0_33, %c0_34, %c0_35] : memref<2x16x128xf32, #tpu.memory_space<vmem>>, vector<2x16x128xf32>
    tpu.vector_store %arg11[%c0_33, %c0_34, %c0_35], %55 {strides = array<i32>} : memref<2x16x128xf32, #tpu.memory_space<vmem>>, vector<2x16x128xf32>,
    return
  }
}

</mosaic_0001>

<bundles_post_ra>
// kernel: tpu_custom_call.1
= control target key start
LH: loop header
LB: loop body
LE: loop exit
PB: predicated region body
PF: predicated region fallthrough
CT: control target
= control target key end

     0   :  { %18 = vsyncpa [#allocation4], 0  ;;  %s1121_s0 = inlined_call_operand.<no memory space> [shape: f32[1], index: 0, kind: input, shape index: {}]   ;;  %s1122_s1 = inlined_call_operand.hbm [shape: f32[16,128], index: 1, kind: input, shape index: {}]   ;;  %s1123_s2 = inlined_call_operand.hbm [shape: f32[16,16], index: 2, kind: input, shape index: {}]   ;;  %s1124_s3 = inlined_call_operand.hbm [shape: f32[128,128], index: 3, kind: input, shape index: {}]   ;;  %s1125_s4 = inlined_call_operand.vmem [shape: f32[1,128], index: 4, kind: input, shape index: {}]   ;;  %s1126_s5 = inlined_call_operand.hbm [shape: f32[128,128], index: 5, kind: input, shape index: {}]   ;;  %s1127_s6 = inlined_call_operand.vmem [shape: f32[1,128], index: 6, kind: input, shape index: {}]   ;;  %s1128_s7 = inlined_call_operand.hbm [shape: f32[1,128], index: 7, kind: input, shape index: {}]   ;;  %s1129_s8 = inlined_call_operand.hbm [shape: f32[1,128], index: 8, kind: input, shape index: {}]   ;;  %s1130_s9 = inlined_call_operand.vmem [shape: f32[2,16,128], index: 9, kind: input, shape index: {}]   ;;  %s1131_s10 = inlined_call_operand.hbm [shape: f32[16,128], index: 10, kind: output, shape index: {0}]   ;;  %s1132_s11 = inlined_call_operand.hbm [shape: f32[2,16,128], index: 11, kind: output, shape index: {1}]  }
   0x1   :  { %19 = vsyncpa [#allocation7], 0 }
   0x2   :  { %20 = vsyncpa [#allocation10], 0 }
   0x3   :  { %21 = vsyncpa [#allocation13], 0 }
   0x4   :  { %22 = vsyncpa [#allocation5], 0 }
   0x5   :  { %23 = vsyncpa [#allocation16], 0  ;;  %s900_s17 = smov [#allocation6]   ;;  %s901_s19 = smov [#allocation9]  }
   0x6   :  { %s43_s18 = sshll.u32 %s900_s17, 4  ;;  %s69_s20 = sshll.u32 %s901_s19, 4  ;;  %s44_s18 = int_to_ptr.vmem [resolvable:$true] %s43_s18  ;;  %s970_s20 = int_to_ptr.vmem [resolvable:$true] %s69_s20 }
   0x7   :  { %s712_s23 = scalar_lea.hbm %s1123_s2, 256 }
   0x8   :  { %p713_p0 = scmp.ne.s32.totalorder %s1123_s2, %s712_s23  ;;  %p716_p1 = scmp.lt.u32.totalorder %s712_s23, %s1123_s2 }
   0xa   :  { %p718_p2 = pnand %p716_p1, %p713_p0 }
   0xc   :  { %721 = shalt.err (!%p718_p2)
}
   0xd   :  { %s722_s28 = scalar_lea.vmem %s44_s18, 256  ;;  %p727_p4 = scmp.lt.s32.totalorder %s44_s18, %s44_s18 }
   0xe   :  { %p723_p3 = scmp.ne.s32.totalorder %s44_s18, %s722_s28  ;;  %p728_p5 = scmp.lt.s32.totalorder %s722_s28, %s722_s28 }
  0x10   :  { %p729_p6 = por %p728_p5, %p727_p4 }
  0x12   :  { %p730_p7 = pnand %p729_p6, %p723_p3 }
  0x14   :  { %733 = shalt.err (!%p730_p7)
}
  0x15   :  { %s902_s29 = smov 128   ;;  %s903_s30 = smov 8  }
  0x16   :  { %49 = dma.hbm_to_vmem [thread:$0]  %s1123_s2, 256, %s44_s18, [#allocation7], %s902_s29, %s902_s29, %s903_s30  }
  0x17   :  { %s734_s16 = scalar_lea.hbm %s1126_s5, 2048 }
  0x18   :  { %p735_p8 = scmp.ne.s32.totalorder %s1126_s5, %s734_s16  ;;  %p738_p9 = scmp.lt.u32.totalorder %s734_s16, %s1126_s5 }
  0x1a   :  { %p740_p10 = pnand %p738_p9, %p735_p8 }
  0x1c   :  { %743 = shalt.err (!%p740_p10)
}
  0x1d   :  { %s744_s23 = scalar_lea.vmem %s970_s20, 2048  ;;  %p749_p12 = scmp.lt.s32.totalorder %s970_s20, %s970_s20 }
  0x1e   :  { %p745_p11 = scmp.ne.s32.totalorder %s970_s20, %s744_s23  ;;  %p750_p13 = scmp.lt.s32.totalorder %s744_s23, %s744_s23 }
  0x20   :  { %p751_p0 = por %p750_p13, %p749_p12 }
  0x22   :  { %p752_p1 = pnand %p751_p0, %p745_p11 }
  0x24   :  { %755 = shalt.err (!%p752_p1)
}
  0x25   :  { %75 = dma.hbm_to_vmem [thread:$0]  %s1126_s5, 2048, %s970_s20, [#allocation10], %s902_s29, %s902_s29, %s903_s30  }
  0x26   :  { %s904_s24 = smov [#allocation3]   ;;  %s905_s26 = smov [#allocation8]  }
  0x27   :  { %s31_s25 = sshll.u32 %s904_s24, 4  ;;  %s55_s27 = sshll.u32 %s905_s26, 4  ;;  %s32_s25 = int_to_ptr.vmem [resolvable:$true] %s31_s25  ;;  %s1007_s27 = int_to_ptr.vmem [resolvable:$true] %s55_s27 }
  0x28   :  { %s756_s13 = scalar_lea.hbm %s1122_s1, 256 }
  0x29   :  { %p757_p2 = scmp.ne.s32.totalorder %s1122_s1, %s756_s13  ;;  %p760_p3 = scmp.lt.u32.totalorder %s756_s13, %s1122_s1 }
  0x2b   :  { %p762_p4 = pnand %p760_p3, %p757_p2 }
  0x2d   :  { %765 = shalt.err (!%p762_p4)
}
  0x2e   :  { %s766_s5 = scalar_lea.vmem %s32_s25, 256  ;;  %p771_p6 = scmp.lt.s32.totalorder %s32_s25, %s32_s25 }
  0x2f   :  { %p767_p5 = scmp.ne.s32.totalorder %s32_s25, %s766_s5  ;;  %p772_p7 = scmp.lt.s32.totalorder %s766_s5, %s766_s5 }
  0x31   :  { %p773_p8 = por %p772_p7, %p771_p6 }
  0x33   :  { %p774_p9 = pnand %p773_p8, %p767_p5 }
  0x35   :  { %777 = shalt.err (!%p774_p9)
}
  0x36   :  { %37 = dma.hbm_to_vmem [thread:$0]  %s1122_s1, 256, %s32_s25, [#allocation4], %s902_s29, %s902_s29, %s903_s30  }
  0x37   :  { %s778_s23 = scalar_lea.hbm %s1124_s3, 2048 }
  0x38   :  { %p779_p10 = scmp.ne.s32.totalorder %s1124_s3, %s778_s23  ;;  %p782_p11 = scmp.lt.u32.totalorder %s778_s23, %s1124_s3 }
  0x3a   :  { %p784_p12 = pnand %p782_p11, %p779_p10 }
  0x3c   :  { %787 = shalt.err (!%p784_p12)
}
  0x3d   :  { %s788_s28 = scalar_lea.vmem %s1007_s27, 2048  ;;  %p793_p0 = scmp.lt.s32.totalorder %s1007_s27, %s1007_s27 }
  0x3e   :  { %p789_p13 = scmp.ne.s32.totalorder %s1007_s27, %s788_s28  ;;  %p794_p1 = scmp.lt.s32.totalorder %s788_s28, %s788_s28 }
  0x40   :  { %p795_p2 = por %p794_p1, %p793_p0 }
  0x42   :  { %p796_p3 = pnand %p795_p2, %p789_p13 }
  0x44   :  { %799 = shalt.err (!%p796_p3)
}
  0x45   :  { %61 = dma.hbm_to_vmem [thread:$0]  %s1124_s3, 2048, %s1007_s27, [#allocation7], %s902_s29, %s902_s29, %s903_s30  }
  0x46   :  { %s906_s12 = smov [#allocation11]   ;;  %s907_s14 = smov [#allocation12]  }
  0x47   :  { %s84_s13 = sshll.u32 %s906_s12, 4  ;;  %s94_s15 = sshll.u32 %s907_s14, 4  ;;  %s85_s13 = int_to_ptr.vmem [resolvable:$true] %s84_s13  ;;  %s95_s15 = int_to_ptr.vmem [resolvable:$true] %s94_s15 }
  0x48   :  { %s800_s5 = scalar_lea.hbm %s1128_s7, 16 }
  0x49   :  { %p801_p4 = scmp.ne.s32.totalorder %s1128_s7, %s800_s5  ;;  %p804_p5 = scmp.lt.u32.totalorder %s800_s5, %s1128_s7 }
  0x4b   :  { %p806_p6 = pnand %p804_p5, %p801_p4 }
  0x4d   :  { %809 = shalt.err (!%p806_p6)
}
  0x4e   :  { %s810_s3 = scalar_lea.vmem %s85_s13, 16  ;;  %s814_s27 = scalar_lea.vmem %s85_s13, 32 }
  0x4f   :  { %p811_p7 = scmp.ne.s32.totalorder %s85_s13, %s810_s3  ;;  %p815_p8 = scmp.lt.s32.totalorder %s85_s13, %s85_s13 }
  0x50   :  { %p816_p9 = scmp.lt.s32.totalorder %s814_s27, %s810_s3 }
  0x52   :  { %p817_p10 = por %p816_p9, %p815_p8 }
  0x54   :  { %p818_p11 = pnand %p817_p10, %p811_p7 }
  0x56   :  { %821 = shalt.err (!%p818_p11)
}
  0x57   :  { %87 = dma.hbm_to_vmem [thread:$0]  %s1128_s7, 16, %s85_s13, [#allocation10]  }
  0x58   :  { %s822_s26 = scalar_lea.hbm %s1129_s8, 16 }
  0x59   :  { %p823_p12 = scmp.ne.s32.totalorder %s1129_s8, %s822_s26  ;;  %p826_p13 = scmp.lt.u32.totalorder %s822_s26, %s1129_s8 }
  0x5b   :  { %p828_p0 = pnand %p826_p13, %p823_p12 }
  0x5d   :  { %831 = shalt.err (!%p828_p0)
}
  0x5e   :  { %s832_s14 = scalar_lea.vmem %s95_s15, 16  ;;  %s836_s16 = scalar_lea.vmem %s95_s15, 32 }
  0x5f   :  { %p833_p1 = scmp.ne.s32.totalorder %s95_s15, %s832_s14  ;;  %p837_p2 = scmp.lt.s32.totalorder %s95_s15, %s95_s15 }
  0x60   :  { %p838_p3 = scmp.lt.s32.totalorder %s836_s16, %s832_s14 }
  0x62   :  { %p839_p4 = por %p838_p3, %p837_p2 }
  0x64   :  { %p840_p5 = pnand %p839_p4, %p833_p1 }
  0x66   :  { %843 = shalt.err (!%p840_p5)
}
  0x67   :  { %97 = dma.hbm_to_vmem [thread:$0]  %s1129_s8, 16, %s95_s15, [#allocation13]  }
  0x68   :  { %888 = dma.done.wait [#allocation4], 256  }
  0x69   :  { %889 = vsyncadd [#allocation4], 4294967040 }
  0x6a   :  { %890 = dma.done.wait [#allocation7], 2304  }
  0x6b   :  { %891 = vsyncadd [#allocation7], 4294964992 }
  0x6c   :  { %892 = dma.done.wait [#allocation10], 2064  }
  0x6d   :  { %893 = vsyncadd [#allocation10], 4294965232 }
  0x6e   :  { %894 = dma.done.wait [#allocation13], 16  }
  0x6f   :  { %895 = vsyncadd [#allocation13], 4294967280  ;;  %v120_v0 = vld [vmem:[#allocation8] sm:$0xff]  ;;  %v121_v1 = vld [vmem:[#allocation8 + $0x8] sm:$0xff]  ;;  %vm220_vm0 = vcmask 130048   ;;  %s908_s17 = smov [#allocation14]  }
  0x70   :  { %v122_v2 = vld [vmem:[#allocation8 + $0x10] sm:$0xff]  ;;  %v632_v3 = vpack.c.bf16 %v121_v1, %v120_v0  ;;  %v123_v4 = vld [vmem:[#allocation8 + $0x18] sm:$0xff]  ;;  %v124_v6 = vld [vmem:[#allocation8 + $0x20] sm:$0xff]  ;;  %s478_s5 = sshll.u32 %s908_s17, 4  ;;  %s479_s5 = int_to_ptr.vmem [resolvable:$true] %s478_s5 }
  0x71   :  { %v636_v5 = vpack.c.bf16 %v123_v4, %v122_v2  ;;  %v125_v7 = vld [vmem:[#allocation8 + $0x28] sm:$0xff]  ;;  %v118_v9 = vld [vmem:[#allocation3] sm:$0xff]  ;;  %v126_v10 = vld [vmem:[#allocation8 + $0x30] sm:$0xff]  ;;  %s844_s20 = scalar_lea.vmem %s479_s5, 256  ;;  %p849_p7 = scmp.lt.s32.totalorder %s479_s5, %s479_s5 }
  0x72   :  { %633 = vmatprep.subr.bf16.mxu0 %v632_v3  ;;  %v640_v8 = vpack.c.bf16 %v125_v7, %v124_v6  ;;  %v127_v11 = vld [vmem:[#allocation8 + $0x38] sm:$0xff]  ;;  %587 = vmatprep.mubr.f32.mxu0 %v118_v9  ;;  %v128_v13 = vld [vmem:[#allocation8 + $0x40] sm:$0xff]  ;;  %v129_v14 = vld [vmem:[#allocation8 + $0x48] sm:$0xff]  ;;  %p845_p6 = scmp.ne.s32.totalorder %s479_s5, %s844_s20  ;;  %p850_p8 = scmp.lt.s32.totalorder %s844_s20, %s844_s20 }
  0x73   :  { %635 = vmatpush3.bf16.msra.mxu0 %v632_v3  ;;  %v644_v12 = vpack.c.bf16 %v127_v11, %v126_v10  ;;  %v648_v15 = vpack.c.bf16 %v129_v14, %v128_v13  ;;  %v130_v16 = vld [vmem:[#allocation8 + $0x50] sm:$0xff]  ;;  %v131_v17 = vld [vmem:[#allocation8 + $0x58] sm:$0xff]  ;;  %v132_v19 = vld [vmem:[#allocation8 + $0x60] sm:$0xff] }
  0x74   :  { %637 = vmatprep.subr.bf16.mxu0 %v636_v5  ;;  %v652_v18 = vpack.c.bf16 %v131_v17, %v130_v16  ;;  %v133_v20 = vld [vmem:[#allocation8 + $0x68] sm:$0xff]  ;;  %v134_v22 = vld [vmem:[#allocation8 + $0x70] sm:$0xff]  ;;  %v135_v23 = vld [vmem:[#allocation8 + $0x78] sm:$0xff]  ;;  %p851_p9 = por %p850_p8, %p849_p7 }
  0x75   :  { %v656_v21 = vpack.c.bf16 %v133_v20, %v132_v19  ;;  %v660_v24 = vpack.c.bf16 %v135_v23, %v134_v22  ;;  %v119_v25 = vld [vmem:[#allocation3 + $0x8] sm:$0xff]  ;;  %v211_v26 = vld [vmem:[#allocation6] sm:$0xff]  ;;  %v306_v27 = vld [vmem:[#allocation9] sm:$0xff] }
  0x76   :  { %594 = vmatprep.mubr.msk.f32.mxu1 %vm220_vm0, %v211_v26  ;;  %v307_v28 = vld [vmem:[#allocation9 + $0x8] sm:$0xff]  ;;  %v308_v33 = vld [vmem:[#allocation9 + $0x10] sm:$0xff]  ;;  %v309_v34 = vld [vmem:[#allocation9 + $0x18] sm:$0xff]  ;;  %p852_p10 = pnand %p851_p9, %p845_p6 }
  0x77   :  { %639 = vmatpush3.bf16.msra.mxu0 %v636_v5  ;;  %v668_v32 = vpack.c.bf16 %v307_v28, %v306_v27  ;;  %v212_v35 = vld [vmem:[#allocation6 + $0x8] sm:$0xff]  ;;  %v672_v36 = vpack.c.bf16 %v309_v34, %v308_v33  ;;  %v310_v37 = vld [vmem:[#allocation9 + $0x20] sm:$0xff]  ;;  %v311_v38 = vld [vmem:[#allocation9 + $0x28] sm:$0xff] }
  0x78   :  { %641 = vmatprep.subr.bf16.mxu0 %v640_v8  ;;  %v676_v39 = vpack.c.bf16 %v311_v38, %v310_v37  ;;  %v312_v40 = vld [vmem:[#allocation9 + $0x30] sm:$0xff]  ;;  %v313_v41 = vld [vmem:[#allocation9 + $0x38] sm:$0xff]  ;;  %v314_v43 = vld [vmem:[#allocation9 + $0x40] sm:$0xff] }
  0x79   :  { %v680_v42 = vpack.c.bf16 %v313_v41, %v312_v40  ;;  %v315_v44 = vld [vmem:[#allocation9 + $0x48] sm:$0xff]  ;;  %v316_v46 = vld [vmem:[#allocation9 + $0x50] sm:$0xff]  ;;  %v317_v47 = vld [vmem:[#allocation9 + $0x58] sm:$0xff] }
  0x7a   :  { %v684_v45 = vpack.c.bf16 %v315_v44, %v314_v43  ;;  %v688_v48 = vpack.c.bf16 %v317_v47, %v316_v46  ;;  %v318_v49 = vld [vmem:[#allocation9 + $0x60] sm:$0xff]  ;;  %v319_v50 = vld [vmem:[#allocation9 + $0x68] sm:$0xff]  ;;  %v320_v52 = vld [vmem:[#allocation9 + $0x70] sm:$0xff] }
  0x7b   :  { %643 = vmatpush3.bf16.msra.mxu0 %v640_v8  ;;  %v692_v51 = vpack.c.bf16 %v319_v50, %v318_v49  ;;  %v321_v53 = vld [vmem:[#allocation9 + $0x78] sm:$0xff]  ;;  %v509_v55 = vld [vmem:[%s1125_s4] ss:$0 sm:$0xff] }
  0x7c   :  { %645 = vmatprep.subr.bf16.mxu0 %v644_v12  ;;  %v696_v54 = vpack.c.bf16 %v321_v53, %v320_v52 }
  0x7f   :  { %647 = vmatpush3.bf16.msra.mxu0 %v644_v12 }
  0x80   :  { %649 = vmatprep.subr.bf16.mxu0 %v648_v15 }
  0x83   :  { %651 = vmatpush3.bf16.msra.mxu0 %v648_v15 }
  0x84   :  { %653 = vmatprep.subr.bf16.mxu0 %v652_v18 }
  0x87   :  { %655 = vmatpush3.bf16.msra.mxu0 %v652_v18 }
  0x88   :  { %657 = vmatprep.subr.bf16.mxu0 %v656_v21 }
  0x8b   :  { %659 = vmatpush3.bf16.msra.mxu0 %v656_v21 }
  0x8c   :  { %661 = vmatprep.subr.bf16.mxu0 %v660_v24 }
  0x8f   :  { %663 = vmatpush3.bf16.msra.mxu0 %v660_v24 }
  0x92   :  { %588 = vmatmul.mubr.f32.vlgmr.msra.gmra.mrb[0].mxu0 %v119_v25 }
 0x165   :  { %v589_v29 = vpop.f32.mrb[0].mxu0 }
 0x166   :  { %v202_v30 = vpop.f32.mrb[1].mxu0 }
 0x167   :  { %v664_v31 = vpack.c.bf16 %v589_v29, %v202_v30 }
 0x169   :  { %665 = vmatprep.subr.bf16.mxu1 %v664_v31 }
 0x16a   :  { %667 = vmatpush3.bf16.msra.mxu1 %v664_v31 }
 0x16b   :  { %669 = vmatprep.subr.bf16.mxu1 %v668_v32 }
 0x16d   :  { %595 = vmatmul.mubr.msk.f32.vlgmr.msra.gmra.mrb[0].mxu1 %vm220_vm0, %v212_v35 }
 0x16e   :  { %671 = vmatpush3.bf16.msra.mxu1 %v668_v32 }
 0x16f   :  { %673 = vmatprep.subr.bf16.mxu1 %v672_v36 }
 0x172   :  { %675 = vmatpush3.bf16.msra.mxu1 %v672_v36 }
 0x173   :  { %677 = vmatprep.subr.bf16.mxu1 %v676_v39 }
 0x176   :  { %679 = vmatpush3.bf16.msra.mxu1 %v676_v39 }
 0x177   :  { %681 = vmatprep.subr.bf16.mxu1 %v680_v42 }
 0x17a   :  { %683 = vmatpush3.bf16.msra.mxu1 %v680_v42 }
 0x17b   :  { %685 = vmatprep.subr.bf16.mxu1 %v684_v45 }
 0x17e   :  { %687 = vmatpush3.bf16.msra.mxu1 %v684_v45 }
 0x17f   :  { %689 = vmatprep.subr.bf16.mxu1 %v688_v48 }
 0x182   :  { %691 = vmatpush3.bf16.msra.mxu1 %v688_v48 }
 0x183   :  { %693 = vmatprep.subr.bf16.mxu1 %v692_v51 }
 0x186   :  { %695 = vmatpush3.bf16.msra.mxu1 %v692_v51 }
 0x187   :  { %697 = vmatprep.subr.bf16.mxu1 %v696_v54 }
 0x18a   :  { %699 = vmatpush3.bf16.msra.mxu1 %v696_v54 }
 0x240   :  { %v596_v56 = vpop.f32.mrb[0].mxu1 }
 0x241   :  { %v299_v57 = vadd.f32 %v596_v56, %v509_v55  ;;  %v293_v58 = vpop.f32.mrb[1].mxu1 }
 0x242   :  { %v294_v59 = vadd.f32 %v509_v55, %v293_v58 }
 0x243   :  { %v303_v60 = vmax.f32 %v299_v57, 0.0 }
 0x244   :  { %v302_v61 = vmax.f32 %v294_v59, 0.0 }
 0x245   :  { %305 = vst [vmem:[#allocation14 + $0x8] sm:$0xff] %v303_v60 }
 0x246   :  { %304 = vst [vmem:[#allocation14] sm:$0xff] %v302_v61  ;;  %629 = vmatprep.mubr.f32.mxu1 %v302_v61 }
 0x247   :  { %630 = vmatmul.mubr.f32.vlgmr.msra.gmra.mrb[2].mxu1 %v303_v60 }
 0x248   :  { %855 = shalt.err (!%p852_p10)
}
 0x249   :  { %s856_s21 = scalar_lea.hbm %s1131_s10, 256 }
 0x24a   :  { %p857_p11 = scmp.ne.s32.totalorder %s1131_s10, %s856_s21  ;;  %p860_p12 = scmp.lt.u32.totalorder %s856_s21, %s1131_s10 }
 0x24c   :  { %p862_p13 = pnand %p860_p12, %p857_p11 }
 0x24e   :  { %865 = shalt.err (!%p862_p13)
}
 0x24f   :  { %484 = dma.vmem_to_hbm [thread:$0]  %s479_s5, 256, %s1131_s10, [#allocation5], %s902_s29, %s902_s29, %s903_s30   ;;  %v513_v25 = vld [vmem:[#allocation11] ss:$0 sm:$0xff]  ;;  %v514_v28 = vld [vmem:[#allocation12] ss:$0 sm:$0xff] }
 0x250   :  { %v512_v62 = vld [vmem:[%s1127_s6] ss:$0 sm:$0xff]  ;;  %v450_v31 = vstv %s1121_s0  ;;  %v456_v35 = vld [vmem:[%s1130_s9 + $0x8] sm:$0xff]  ;;  %v457_v36 = vld [vmem:[%s1130_s9 + $0x10] sm:$0xff]  ;;  %s909_s0 = smov [#allocation15]  }
 0x251   :  { %v455_v34 = vld [vmem:[%s1130_s9] sm:$0xff]  ;;  %v458_v37 = vld [vmem:[%s1130_s9 + $0x18] sm:$0xff]  ;;  %vm460_vm4 = vcmp.ge.f32.partialorder %v456_v35, 0.2  ;;  %s490_s8 = sshll.u32 %s909_s0, 4  ;;  %s491_s8 = int_to_ptr.vmem [resolvable:$true] %s490_s8 }
 0x252   :  { %vm459_vm3 = vcmp.ge.f32.partialorder %v455_v34, 0.2  ;;  %vm461_vm5 = vcmp.ge.f32.partialorder %v457_v36, 0.2  ;;  %vm462_vm6 = vcmp.ge.f32.partialorder %v458_v37, 0.2  ;;  %p871_p1 = scmp.lt.s32.totalorder %s491_s8, %s491_s8 }
 0x253   :  { %s866_s9 = scalar_lea.vmem %s491_s8, 512 }
 0x254   :  { %p867_p0 = scmp.ne.s32.totalorder %s491_s8, %s866_s9  ;;  %p872_p2 = scmp.lt.s32.totalorder %s866_s9, %s866_s9 }
 0x256   :  { %p873_p3 = por %p872_p2, %p871_p1 }
 0x258   :  { %p874_p4 = pnand %p873_p3, %p867_p0 }
 0x31a   :  { %v631_v63 = vpop.f32.mrb[2].mxu1 }
 0x31b   :  { %v401_v0 = vadd.f32 %v631_v63, %v512_v62  ;;  %v395_v1 = vpop.f32.mrb[3].mxu1 }
 0x31c   :  { %v396_v2 = vadd.f32 %v512_v62, %v395_v1 }
 0x31e   :  { %v404_v3 = vadd.f32 %v401_v0, %v396_v2 }
 0x320   :  { %v405_v4 = vrot.slane %v404_v3, 4 }
 0x322   :  { %v406_v5 = vadd.f32 %v405_v4, %v404_v3 }
 0x324   :  { %v407_v6 = vrot.slane %v406_v5, 2 }
 0x326   :  { %v408_v7 = vadd.f32 %v407_v6, %v406_v5 }
 0x328   :  { %v409_v8 = vrot.slane %v408_v7, 1 }
 0x32a   :  { %v410_v9 = vadd.f32 %v409_v8, %v408_v7 }
 0x32c   :  { %v412_v10 = vmul.f32 0.0625, %v410_v9 }
 0x32e   :  { %v413_v11 = vsub.f32 %v396_v2, %v412_v10  ;;  %v414_v12 = vsub.f32 %v401_v0, %v412_v10 }
 0x330   :  { %v415_v13 = vmul.f32 %v413_v11, %v413_v11  ;;  %v416_v14 = vmul.f32 %v414_v12, %v414_v12 }
 0x332   :  { %v417_v15 = vadd.f32 %v416_v14, %v415_v13 }
 0x334   :  { %v418_v16 = vrot.slane %v417_v15, 4 }
 0x336   :  { %v419_v17 = vadd.f32 %v418_v16, %v417_v15 }
 0x338   :  { %v420_v18 = vrot.slane %v419_v17, 2 }
 0x33a   :  { %v421_v19 = vadd.f32 %v420_v18, %v419_v17 }
 0x33c   :  { %v422_v20 = vrot.slane %v421_v19, 1 }
 0x33e   :  { %v423_v21 = vadd.f32 %v422_v20, %v421_v19 }
 0x340   :  { %v424_v22 = vmul.f32 0.0625, %v423_v21 }
 0x342   :  { %v425_v23 = vadd.f32 1e-05, %v424_v22 }
 0x344   :  { %710 = vrsqrt.f32 %v425_v23 }
 0x34e   :  { %v711_v24 = vpop.eup %710 }
 0x34f   :  { %v427_v26 = vmul.f32 %v711_v24, %v413_v11  ;;  %v428_v27 = vmul.f32 %v711_v24, %v414_v12 }
 0x351   :  { %v436_v29 = vmul.f32 %v513_v25, %v427_v26  ;;  %v437_v30 = vmul.f32 %v513_v25, %v428_v27 }
 0x353   :  { %v445_v32 = vadd.f32 %v514_v28, %v436_v29  ;;  %v446_v33 = vadd.f32 %v514_v28, %v437_v30 }
 0x355   :  { %vm448_vm1 = vcmp.ge.f32.partialorder %v445_v32, 0.0  ;;  %v451_v38 = vmul.f32 %v450_v31, %v445_v32  ;;  %v452_v39 = vmul.f32 %v450_v31, %v446_v33  ;;  %vm449_vm2 = vcmp.ge.f32.partialorder %v446_v33, 0.0 }
 0x357   :  { %v453_v40 = vsel %vm448_vm1, %v445_v32, %v451_v38  ;;  %v454_v41 = vsel %vm449_vm2, %v446_v33, %v452_v39 }
 0x358   :  { %v463_v42 = vmul.f32 1.25, %v453_v40  ;;  %v464_v43 = vmul.f32 1.25, %v454_v41 }
 0x35a   :  { %v465_v44 = vsel %vm459_vm3, %v463_v42, 0.0  ;;  %v466_v45 = vsel %vm460_vm4, %v464_v43, 0.0  ;;  %v467_v46 = vsel %vm461_vm5, %v463_v42, 0.0  ;;  %v468_v47 = vsel %vm462_vm6, %v464_v43, 0.0 }
 0x35b   :  { %469 = vst [vmem:[#allocation15] sm:$0xff] %v465_v44  ;;  %470 = vst [vmem:[#allocation15 + $0x8] sm:$0xff] %v466_v45 }
 0x35c   :  { %471 = vst [vmem:[#allocation15 + $0x10] sm:$0xff] %v467_v46  ;;  %472 = vst [vmem:[#allocation15 + $0x18] sm:$0xff] %v468_v47 }
 0x35d   :  { %877 = shalt.err (!%p874_p4)
}
 0x35e   :  { %s878_s5 = scalar_lea.hbm %s1132_s11, 512 }
 0x35f   :  { %p879_p5 = scmp.ne.s32.totalorder %s1132_s11, %s878_s5  ;;  %p882_p6 = scmp.lt.u32.totalorder %s878_s5, %s1132_s11 }
 0x361   :  { %p884_p7 = pnand %p882_p6, %p879_p5 }
 0x363   :  { %887 = shalt.err (!%p884_p7)
}
 0x364   :  { %496 = dma.vmem_to_hbm [thread:$0]  %s491_s8, 512, %s1132_s11, [#allocation16], %s902_s29, %s902_s29, %s903_s30  }
 0x365   :  { %896 = dma.done.wait [#allocation5], 256  }
 0x366   :  { %897 = vsyncadd [#allocation5], 4294967040 }
 0x367   :  { %898 = dma.done.wait [#allocation16], 512  }
 0x368   :  { %899 = vsyncadd [#allocation16], 4294966784 }
 0x369   :  { %503 = vsyncpa [#allocation4], 1 }
 0x36a   :  { %504 = vsyncpa [#allocation7], 1 }
 0x36b   :  { %505 = vsyncpa [#allocation10], 1 }
 0x36c   :  { %506 = vsyncpa [#allocation13], 1 }
 0x36d   :  { %507 = vsyncpa [#allocation5], 1 }
 0x36e   :  { %508 = vsyncpa [#allocation16], 1 }

</bundles_post_ra>
